<compile_context>
chip_gen: v5e
topology: v5e:2x2
jax: 0.10.0
libtpu: 0.0.40
codegen_flags: <defaults>
</compile_context>

<pallas_src>
import jax
import jax.numpy as jnp
from jax import lax
from jax.experimental import pallas as pl
from jax.experimental.pallas import tpu as pltpu

_SMOOTH = 1.0
_LANE = 128                 # vreg lane width
_NCORES = 2                 # leading grid axis (v7x megacore); harmless on 1-TC chips
_BLOCK_BUDGET = 1 << 20     # ~1 MiB per input per pipeline buffer
_CHUNK_ELEMS = 64 * _LANE   # in-kernel fold granularity (~8 f32 vregs / operand)


def _round_up(x, m):
    return ((x + m - 1) // m) * m


def _make_dice_kernel(*, N, H, W, TB, TH, nb, nh, total, steps, CB, CH):
    need_blk = (_NCORES * steps != total)   # some (core, step) pairs are idle
    need_b = (nb * TB != N)                 # last batch block is ragged
    need_h = (nh * TH != H)                 # last H block is ragged

    def kernel(yp_ref, yt_ref, inter_ref, denom_ref):
        c = pl.program_id(0)
        i = pl.program_id(1)

        @pl.when(i == 0)
        def _init():
            inter_ref[...] = jnp.zeros_like(inter_ref)
            denom_ref[...] = jnp.zeros_like(denom_ref)

        blk = c * steps + i
        if need_b or need_h:
            blk_c = jnp.minimum(blk, total - 1) if need_blk else blk
            bb = blk_c // nh if nh > 1 else blk_c
            hb = blk_c % nh if nh > 1 else 0
        else:
            bb = hb = None

        def accumulate():
            inter_acc = jnp.zeros((1, W), jnp.float32)
            denom_acc = jnp.zeros((1, W), jnp.float32)
            # Static chunk loop: each chunk is ~_CHUNK_ELEMS elements so the
            # cast/mul/add chain lives in a handful of vregs (no big VMEM
            # temporaries / spills), per the v7x feedback.
            for b_off in range(0, TB, CB):
                cb = min(CB, TB - b_off)
                for h_off in range(0, TH, CH):
                    ch = min(CH, TH - h_off)
                    yp = yp_ref[pl.ds(b_off, cb), pl.ds(h_off, ch), :].astype(jnp.float32)
                    yt = yt_ref[pl.ds(b_off, cb), pl.ds(h_off, ch), :].astype(jnp.float32)
                    if need_b:   # mask batch rows past N (ragged last batch block)
                        bid = (bb * TB + b_off
                               + lax.broadcasted_iota(jnp.int32, (cb, 1, 1), 0))
                        m = (bid < N).astype(jnp.float32)
                        yp = yp * m
                        yt = yt * m
                    if need_h:   # mask image rows past H (ragged last H block)
                        hid = (hb * TH + h_off
                               + lax.broadcasted_iota(jnp.int32, (1, ch, 1), 1))
                        m = (hid < H).astype(jnp.float32)
                        yp = yp * m
                        yt = yt * m
                    prod = jnp.sum(yp * yt, axis=0)          # (ch, W) — VPU adds
                    ssum = jnp.sum(yp + yt, axis=0)          # fused denominator
                    inter_acc = inter_acc + jnp.sum(prod, axis=0, keepdims=True)
                    denom_acc = denom_acc + jnp.sum(ssum, axis=0, keepdims=True)
            inter_ref[...] += inter_acc
            denom_ref[...] += denom_acc

        if need_blk:
            @pl.when(blk < total)
            def _():
                accumulate()
        else:
            accumulate()

    return kernel


def dice_loss(y_pred, y_true):
    assert y_pred.shape == y_true.shape
    assert y_pred.ndim == 4, "expects NCHW"
    N, _, H, W = y_pred.shape
    itemsize = max(jnp.dtype(y_pred.dtype).itemsize, jnp.dtype(y_true.dtype).itemsize)

    sub = max(8, 32 // itemsize)            # native-dtype sublane packing
    w_lane = _round_up(W, _LANE)            # VMEM lanes one image row occupies
    plane_vmem = _round_up(H, sub) * w_lane * itemsize    # one (H, W) channel plane

    if plane_vmem <= _BLOCK_BUDGET:
        # Full (H, W) channel-0 planes per block (full-dim block dims are exempt
        # from the (8,128) rule); pack several batch elements per block.
        TH, nh = H, 1
        TB = max(1, min(_BLOCK_BUDGET // plane_vmem, pl.cdiv(N, _NCORES)))
    else:
        # Large planes (v7x VMEM budget): tile H in sublane multiples, one
        # batch element per block.
        TB = 1
        TH = max(sub, ((_BLOCK_BUDGET // (w_lane * itemsize)) // sub) * sub)
        nh = pl.cdiv(H, TH)
    nb = pl.cdiv(N, TB)
    total = nb * nh                      # real blocks in the reduction
    steps = pl.cdiv(total, _NCORES)      # inner (reduction) steps per core
    clamp = (_NCORES * steps != total)

    # In-kernel fold chunk sizes (rows per chunk is a multiple of the sublane
    # packing so chunk starts stay aligned).
    CH = min(TH, max(sub, (_CHUNK_ELEMS // w_lane) // sub * sub))
    CB = min(TB, max(1, _CHUNK_ELEMS // (CH * w_lane)))

    def in_map(c, i):
        b = c * steps + i
        if clamp:
            b = jnp.minimum(b, total - 1)   # idle steps re-read a valid block (masked off)
        if nh == 1:
            return (b, 0, 0, 0)             # (batch block, channel 0, h block, w block)
        return (b // nh, 0, b % nh, 0)

    in_spec = pl.BlockSpec((TB, None, TH, W), in_map)              # channel dim squeezed
    out_spec = pl.BlockSpec((1, None, W), lambda c, i: (c, 0, 0))  # resident per core

    kernel = _make_dice_kernel(N=N, H=H, W=W, TB=TB, TH=TH, nb=nb, nh=nh,
                               total=total, steps=steps, CB=CB, CH=CH)

    cost = pl.CostEstimate(
        flops=5 * N * H * W,
        transcendentals=0,
        bytes_accessed=2 * N * H * W * itemsize + 2 * _NCORES * W * 4,
    )

    inter_p, denom_p = pl.pallas_call(
        kernel,
        out_shape=(
            jax.ShapeDtypeStruct((_NCORES, 1, W), jnp.float32),
            jax.ShapeDtypeStruct((_NCORES, 1, W), jnp.float32),
        ),
        grid_spec=pltpu.PrefetchScalarGridSpec(
            num_scalar_prefetch=0,
            grid=(_NCORES, steps),
            in_specs=[in_spec, in_spec],
            out_specs=(out_spec, out_spec),
        ),
        compiler_params=pltpu.CompilerParams(
            dimension_semantics=("parallel", "arbitrary"),
        ),
        cost_estimate=cost,
    )(y_pred, y_true)

    # Single tiny cross-lane/cross-core reduction outside the kernel.
    inter = jnp.sum(inter_p)
    denom = jnp.sum(denom_p)
    dsc = (2.0 * inter + _SMOOTH) / (denom + _SMOOTH)
    return 1.0 - dsc


def _dice_ref(y_pred, y_true):
    yp = y_pred[:, 0].reshape(-1).astype(jnp.float32)
    yt = y_true[:, 0].reshape(-1).astype(jnp.float32)
    inter = jnp.sum(yp * yt)
    dsc = (2.0 * inter + _SMOOTH) / (jnp.sum(yp) + jnp.sum(yt) + _SMOOTH)
    return 1.0 - dsc


if __name__ == "__main__":
    key = jax.random.PRNGKey(0)
    k1, k2 = jax.random.split(key)
    shape = (2, 4, 16, 16)   # NCHW, as the PyTorch module expects
    y_pred = jax.nn.sigmoid(jax.random.normal(k1, shape, dtype=jnp.float32))
    y_true = (jax.random.uniform(k2, shape) > 0.5).astype(jnp.float32)

    out = jax.block_until_ready(dice_loss(y_pred, y_true))
    ref = _dice_ref(y_pred, y_true)
    assert jnp.allclose(out, ref, atol=1e-5, rtol=1e-5), (out, ref)
    print("KERNEL_OK")
</pallas_src>

<mosaic_0001>
module attributes {stable_mosaic.version = 11 : i64} {
  func.func @kernel(%arg0: i32, %arg1: i32, %arg2: memref<1x1x16x16xf32, #tpu.memory_space<vmem>>, %arg3: memref<1x1x16x16xf32, #tpu.memory_space<vmem>>, %arg4: memref<1x1x16xf32, #tpu.memory_space<vmem>>, %arg5: memref<1x1x16xf32, #tpu.memory_space<vmem>>) attributes {dimension_semantics = [#tpu.dimension_semantics<parallel>, #tpu.dimension_semantics<arbitrary>], iteration_bounds = array<i64: 2, 1>, scalar_prefetch = 0 : i64, scratch_operands = 0 : i64, tpu.core_type = #tpu.core_type<tc>, window_params = [{transform_indices = @transform_0, window_bounds = array<i64: 1, 1, 16, 16>}, {transform_indices = @transform_1, window_bounds = array<i64: 1, 1, 16, 16>}, {transform_indices = @transform_2, window_bounds = array<i64: 1, 1, 16>}, {transform_indices = @transform_3, window_bounds = array<i64: 1, 1, 16>}]} {
    %c0_i32 = arith.constant 0 : i32
    %0 = arith.cmpi eq, %arg1, %c0_i32 : i32
    %1 = arith.extui %0 : i1 to i32
    %c0_i32_0 = arith.constant 0 : i32
    %2 = arith.cmpi ne, %1, %c0_i32_0 : i32
    scf.if %2 {
      %cst_25 = arith.constant 0.000000e+00 : f32
      %31 = vector.broadcast %cst_25 : f32 to vector<1x16xf32>
      %c0_26 = arith.constant 0 : index
      %c0_27 = arith.constant 0 : index
      %c0_28 = arith.constant 0 : index
      %32 = vector.load %arg4[%c0_26, %c0_27, %c0_28] : memref<1x1x16xf32, #tpu.memory_space<vmem>>, vector<1x1x16xf32>
      %33 = vector.shape_cast %32 : vector<1x1x16xf32> to vector<1x16xf32>
      %34 = vector.shape_cast %31 : vector<1x16xf32> to vector<1x1x16xf32>
      tpu.vector_store %arg4[%c0_26, %c0_27, %c0_28], %34 {strides = array<i32>} : memref<1x1x16xf32, #tpu.memory_space<vmem>>, vector<1x1x16xf32>,
      %cst_29 = arith.constant 0.000000e+00 : f32
      %35 = vector.broadcast %cst_29 : f32 to vector<1x16xf32>
      %c0_30 = arith.constant 0 : index
      %c0_31 = arith.constant 0 : index
      %c0_32 = arith.constant 0 : index
      %36 = vector.load %arg5[%c0_30, %c0_31, %c0_32] : memref<1x1x16xf32, #tpu.memory_space<vmem>>, vector<1x1x16xf32>
      %37 = vector.shape_cast %36 : vector<1x1x16xf32> to vector<1x16xf32>
      %38 = vector.shape_cast %35 : vector<1x16xf32> to vector<1x1x16xf32>
      tpu.vector_store %arg5[%c0_30, %c0_31, %c0_32], %38 {strides = array<i32>} : memref<1x1x16xf32, #tpu.memory_space<vmem>>, vector<1x1x16xf32>,
    } else {
    }
    %cst = arith.constant 0.000000e+00 : f32
    %3 = vector.broadcast %cst : f32 to vector<1x16xf32>
    %cst_1 = arith.constant 0.000000e+00 : f32
    %4 = vector.broadcast %cst_1 : f32 to vector<1x16xf32>
    %c0 = arith.constant 0 : index
    %c0_2 = arith.constant 0 : index
    %c0_3 = arith.constant 0 : index
    %c0_4 = arith.constant 0 : index
    %5 = vector.load %arg2[%c0, %c0_2, %c0_3, %c0_4] : memref<1x1x16x16xf32, #tpu.memory_space<vmem>>, vector<1x1x16x16xf32>
    %6 = vector.shape_cast %5 : vector<1x1x16x16xf32> to vector<1x16x16xf32>
    %c0_5 = arith.constant 0 : index
    %c0_6 = arith.constant 0 : index
    %c0_7 = arith.constant 0 : index
    %c0_8 = arith.constant 0 : index
    %7 = vector.load %arg3[%c0_5, %c0_6, %c0_7, %c0_8] : memref<1x1x16x16xf32, #tpu.memory_space<vmem>>, vector<1x1x16x16xf32>
    %8 = vector.shape_cast %7 : vector<1x1x16x16xf32> to vector<1x16x16xf32>
    %9 = arith.mulf %6, %8 : vector<1x16x16xf32>
    %cst_9 = arith.constant dense<0.000000e+00> : vector<16x16xf32>
    %10 = vector.multi_reduction <add>, %9, %cst_9 [0] : vector<1x16x16xf32> to vector<16x16xf32>
    %11 = arith.addf %6, %8 : vector<1x16x16xf32>
    %cst_10 = arith.constant dense<0.000000e+00> : vector<16x16xf32>
    %12 = vector.multi_reduction <add>, %11, %cst_10 [0] : vector<1x16x16xf32> to vector<16x16xf32>
    %cst_11 = arith.constant dense<0.000000e+00> : vector<16xf32>
    %13 = vector.multi_reduction <add>, %10, %cst_11 [0] : vector<16x16xf32> to vector<16xf32>
    %14 = vector.shape_cast %13 : vector<16xf32> to vector<1x16xf32>
    %15 = arith.addf %3, %14 : vector<1x16xf32>
    %cst_12 = arith.constant dense<0.000000e+00> : vector<16xf32>
    %16 = vector.multi_reduction <add>, %12, %cst_12 [0] : vector<16x16xf32> to vector<16xf32>
    %17 = vector.shape_cast %16 : vector<16xf32> to vector<1x16xf32>
    %18 = arith.addf %4, %17 : vector<1x16xf32>
    %c0_13 = arith.constant 0 : index
    %c0_14 = arith.constant 0 : index
    %c0_15 = arith.constant 0 : index
    %19 = vector.load %arg4[%c0_13, %c0_14, %c0_15] : memref<1x1x16xf32, #tpu.memory_space<vmem>>, vector<1x1x16xf32>
    %20 = vector.shape_cast %19 : vector<1x1x16xf32> to vector<1x16xf32>
    %21 = arith.addf %20, %15 : vector<1x16xf32>
    %c0_16 = arith.constant 0 : index
    %c0_17 = arith.constant 0 : index
    %c0_18 = arith.constant 0 : index
    %22 = vector.load %arg4[%c0_16, %c0_17, %c0_18] : memref<1x1x16xf32, #tpu.memory_space<vmem>>, vector<1x1x16xf32>
    %23 = vector.shape_cast %22 : vector<1x1x16xf32> to vector<1x16xf32>
    %24 = vector.shape_cast %21 : vector<1x16xf32> to vector<1x1x16xf32>
    tpu.vector_store %arg4[%c0_16, %c0_17, %c0_18], %24 {strides = array<i32>} : memref<1x1x16xf32, #tpu.memory_space<vmem>>, vector<1x1x16xf32>,
    %c0_19 = arith.constant 0 : index
    %c0_20 = arith.constant 0 : index
    %c0_21 = arith.constant 0 : index
    %25 = vector.load %arg5[%c0_19, %c0_20, %c0_21] : memref<1x1x16xf32, #tpu.memory_space<vmem>>, vector<1x1x16xf32>
    %26 = vector.shape_cast %25 : vector<1x1x16xf32> to vector<1x16xf32>
    %27 = arith.addf %26, %18 : vector<1x16xf32>
    %c0_22 = arith.constant 0 : index
    %c0_23 = arith.constant 0 : index
    %c0_24 = arith.constant 0 : index
    %28 = vector.load %arg5[%c0_22, %c0_23, %c0_24] : memref<1x1x16xf32, #tpu.memory_space<vmem>>, vector<1x1x16xf32>
    %29 = vector.shape_cast %28 : vector<1x1x16xf32> to vector<1x16xf32>
    %30 = vector.shape_cast %27 : vector<1x16xf32> to vector<1x1x16xf32>
    tpu.vector_store %arg5[%c0_22, %c0_23, %c0_24], %30 {strides = array<i32>} : memref<1x1x16xf32, #tpu.memory_space<vmem>>, vector<1x1x16xf32>,
    return
  }
  func.func @transform_0(%arg0: i32, %arg1: i32) -> (i32, i32, i32, i32) {
    %c1_i32 = arith.constant 1 : i32
    %0 = arith.muli %arg0, %c1_i32 : i32
    %1 = arith.addi %0, %arg1 : i32
    %c0_i32 = arith.constant 0 : i32
    %c0_i32_0 = arith.constant 0 : i32
    %c0_i32_1 = arith.constant 0 : i32
    %c0_i32_2 = arith.constant 0 : i32
    return %1, %c0_i32, %c0_i32_0, %c0_i32_1 : i32, i32, i32, i32
  }
  func.func @transform_1(%arg0: i32, %arg1: i32) -> (i32, i32, i32, i32) {
    %c1_i32 = arith.constant 1 : i32
    %0 = arith.muli %arg0, %c1_i32 : i32
    %1 = arith.addi %0, %arg1 : i32
    %c0_i32 = arith.constant 0 : i32
    %c0_i32_0 = arith.constant 0 : i32
    %c0_i32_1 = arith.constant 0 : i32
    %c0_i32_2 = arith.constant 0 : i32
    return %1, %c0_i32, %c0_i32_0, %c0_i32_1 : i32, i32, i32, i32
  }
  func.func @transform_2(%arg0: i32, %arg1: i32) -> (i32, i32, i32) {
    %c0_i32 = arith.constant 0 : i32
    %c0_i32_0 = arith.constant 0 : i32
    %c0_i32_1 = arith.constant 0 : i32
    return %arg0, %c0_i32, %c0_i32_0 : i32, i32, i32
  }
  func.func @transform_3(%arg0: i32, %arg1: i32) -> (i32, i32, i32) {
    %c0_i32 = arith.constant 0 : i32
    %c0_i32_0 = arith.constant 0 : i32
    %c0_i32_1 = arith.constant 0 : i32
    return %arg0, %c0_i32, %c0_i32_0 : i32, i32, i32
  }
}

</mosaic_0001>

<bundles_post_ra>
// kernel: tpu_custom_call.1
= control target key start
LH: loop header
LB: loop body
LE: loop exit
PB: predicated region body
PF: predicated region fallthrough
CT: control target
= control target key end

     0   :  { %s945_s0 = inlined_call_operand.hbm [shape: f32[2,4,16,16], index: 0, kind: input, shape index: {}]   ;;  %s946_s1 = inlined_call_operand.hbm [shape: f32[2,4,16,16], index: 1, kind: input, shape index: {}]   ;;  %s947_s2 = inlined_call_operand.hbm [shape: f32[2,1,16], index: 2, kind: output, shape index: {0}]   ;;  %s948_s3 = inlined_call_operand.hbm [shape: f32[2,1,16], index: 3, kind: output, shape index: {1}]  }
   0x1   :  { %949 = sst [smem:[#allocation14_spill]] %s945_s0 }
   0x2   :  { %9 = vsyncpa [#allocation3], 0 }
   0x3   :  { %11 = vsyncpa [#allocation3 + $0x1], 0 }
   0x4   :  { %12 = vsyncpa [#allocation6], 0 }
   0x5   :  { %14 = vsyncpa [#allocation6 + $0x1], 0 }
   0x6   :  { %15 = vsyncpa [#allocation4], 0 }
   0x7   :  { %17 = vsyncpa [#allocation4 + $0x1], 0 }
   0x8   :  { %18 = vsyncpa [#allocation9], 0 }
   0x9   :  { %20 = vsyncpa [#allocation9 + $0x1], 0  ;;  %s761_s12 = smov 0   ;;  %s763_s13 = smov 0  }
   0xa   :  { %s765_s14 = smov 0   ;;  %s767_s15 = smov 0  }
   0xb   :  { %s769_s16 = smov 0   ;;  %s771_s17 = smov 0  }
   0xc LB: > { %s466_s18 = sadd.s32 4294967295, %s736_s17   ;;  %s467_s19 = sadd.s32 4294967294, %s736_s17   ;;  %s736_s17 = sphi %s771_s17, %s26_s17   ;;  %s732_s16 = sphi %s769_s16, %s960_s16   ;;  %s728_s15 = sphi %s767_s15, %s959_s15   ;;  %s724_s14 = sphi %s765_s14, %s958_s14   ;;  %s720_s13 = sphi %s763_s13, %s957_s13   ;;  %s716_s12 = sphi %s761_s12, %s956_s12  }
   0xd   : > { %s38_s20 = sadd.s32 1, %s732_s16  ;;  %s47_s21 = sadd.s32 1, %s724_s14 }
   0xe   : > { %p40_p0 = scmp.ge.s32.totalorder %s38_s20, 2  ;;  %p54_p1 = scmp.ne.s32.totalorder %s724_s14, %s720_s13 }
   0xf   : > { %p55_p2 = scmp.eq.s32.totalorder %s736_s17, 0  ;;  %p60_p3 = scmp.ne.s32.totalorder %s720_s13, %s716_s12 }
  0x10   : > { %s962_s20 = smov (%p40_p0, %s38_s20), 0  ;;  %p61_p5 = scmp.eq.s32.totalorder %s466_s18, 0 }
  0x11   : > { %p802_p4 = por %p55_p2, %p54_p1  ;;  %s44_s23 = ssub.s32 %s732_s16, %s962_s20 }
  0x12   : > { %p112_p6 = scmp.eq.s32.totalorder %s466_s18, 1  ;;  %p45_p7 = scmp.eq.s32.totalorder %s44_s23, 0 }
  0x13   : > { %p808_p8 = por %p61_p5, %p60_p3  ;;  %p118_p10 = scmp.eq.s32.totalorder %s467_s19, 1 }
  0x14   : > { %p812_p9 = por %p112_p6, %p54_p1  ;;  %p469_p12 = scmp.ge.s32.totalorder %s736_s17, 2 }
  0x15   : > { %s817_s26 = scalar_select %p45_p7, %s724_s14, %s47_s21  }
  0x16   : > { %p819_p11 = por %p118_p10, %p60_p3  ;;  %p505_p13 = scmp.lt.s32.totalorder %s736_s17, 2 }
  0x17   : > { %s826_s28 = sand.u32 1, %s724_s14   ;;  %s481_s30 = sshll.u32 %s732_s16, 6 }
  0x18   : > { %s470_s29 = sshll.u32 %s826_s28, 4  ;;  %s954_s0 = sld [smem:[#allocation14_spill]] }
  0x19   : > { %s168_s7 = scalar_lea.vmem [#allocation2], %s470_s29  ;;  %p835_p0 = pnand %p505_p13, %p802_p4 }
  0x1a   : > { %s177_s8 = sshll.u32 %s168_s7, 4  ;;  %p476_p1 = scmp.ge.s32.totalorder %s736_s17, 1  ;;  %s178_s8 = int_to_ptr.vmem [resolvable:$true] %s177_s8 }
  0x1b   : > { %s165_s11 = scalar_lea.sflag [#allocation3], %s826_s28  ;;  %s738_s18 = smov 128  }
  0x1c   : > { %s739_s19 = smov 8   ;;  %p208_p2 = scmp.lt.s32.totalorder %s736_s17, 3 }
  0x1d   : > { %s197_s4 = scalar_lea.hbm %s946_s1, %s481_s30  ;;  %s191_s22 = scalar_lea.vmem [#allocation5], %s470_s29 }
  0x1e   : > { %s174_s6 = scalar_lea.hbm %s954_s0, %s481_s30  ;;  %p209_p3 = pnand %p476_p1, %p208_p2 }
  0x1f   : > { %s175_s9 = sshll.u32 %s174_s6, 4  ;;  %s198_s5 = sshll.u32 %s197_s4, 4  ;;  %s176_s9 = int_to_ptr.hbm [resolvable:$true] %s175_s9  ;;  %s199_s5 = int_to_ptr.hbm [resolvable:$true] %s198_s5 }
  0x20   : > { %494 = dma.hbm_to_vmem [thread:$0]  (!%p835_p0), %s176_s9, 256, %s178_s8, %s165_s11, %s738_s18, %s738_s18, %s739_s19  }
  0x21   : > { %s200_s6 = sshll.u32 %s191_s22, 4  ;;  %s188_s7 = scalar_lea.sflag [#allocation6], %s826_s28  ;;  %s201_s6 = int_to_ptr.vmem [resolvable:$true] %s200_s6 }
  0x22   : > { %497 = dma.hbm_to_vmem [thread:$0]  (!%p835_p0), %s199_s5, 256, %s201_s6, %s188_s7, %s738_s18, %s738_s18, %s739_s19  }
  0x23   : > { %212 = sbr.rel (%p209_p3) target bundleno = 81 (0x51), region = 28  ;;  %s851_s0 = sand.u32 (!%p209_p3), 1, %s720_s13  }
  0x24   : > { %s477_s8 = sshll.u32 (!%p209_p3), %s851_s0, 4  ;;  %s215_s9 = scalar_lea.sflag (!%p209_p3), [#allocation3], %s851_s0 }
  0x25   : > { %s218_s11 = scalar_lea.vmem (!%p209_p3), [#allocation2], %s477_s8 }
  0x28   : > { %699 = dma.done.wait (%p808_p8), %s215_s9, 256  }
  0x29   : > { %701 = vsyncadd (%p808_p8), %s215_s9, 4294967040  ;;  %s225_s28 = scalar_lea.sflag [#allocation6], %s851_s0  ;;  %s228_s29 = scalar_lea.vmem [#allocation5], %s477_s8 }
  0x2a   : > { %703 = dma.done.wait (%p808_p8), %s225_s28, 256  }
  0x2b   : > { %705 = vsyncadd (%p808_p8), %s225_s28, 4294967040  ;;  %vm266_vm0 = vcmask 122880   ;;  %s865_s30 = scalar_lea.vmem [#allocation7], %s851_s0  ;;  %v740_v0 = vmov 0.0   ;;  %s870_s10 = scalar_lea.vmem [#allocation8], %s851_s0  ;;  %v269_v1 = vld [vmem:[%s218_s11] sm:$0xff] }
  0x2c   : > { %267 = vst.msk [vmem:[%s865_s30] sm:$0x1] %vm266_vm0, %v740_v0  ;;  %v270_v2 = vld [vmem:[%s218_s11 + $0x8] sm:$0xff]  ;;  %v271_v3 = vld [vmem:[%s228_s29] sm:$0xff]  ;;  %vm281_vm1 = vcmask 130048   ;;  %s322_s19 = scalar_lea.hbm %s947_s2, %s728_s15  ;;  %s335_s4 = scalar_lea.hbm %s948_s3, %s728_s15 }
  0x2d   : > { %268 = vst.msk [vmem:[%s870_s10] sm:$0x1] %vm266_vm0, %v740_v0  ;;  %v272_v4 = vld [vmem:[%s228_s29 + $0x8] sm:$0xff]  ;;  %v273_v5 = vmul.f32 %v271_v3, %v269_v1  ;;  %v277_v6 = vadd.f32 %v271_v3, %v269_v1  ;;  %s324_s5 = sshll.u32 %s865_s30, 4  ;;  %s326_s22 = sshll.u32 %s322_s19, 4  ;;  %s325_s5 = int_to_ptr.vmem [resolvable:$true] %s324_s5  ;;  %s327_s22 = int_to_ptr.hbm [resolvable:$true] %s326_s22 }
  0x2e   : > { %v274_v7 = vmul.f32 %v272_v4, %v270_v2  ;;  %v278_v8 = vadd.f32 %v272_v4, %v270_v2  ;;  %s337_s6 = sshll.u32 %s870_s10, 4  ;;  %s886_s7 = sshll.u32 %s335_s4, 4  ;;  %s888_s6 = int_to_ptr.vmem [resolvable:$true] %s337_s6  ;;  %s340_s7 = int_to_ptr.hbm [resolvable:$true] %s886_s7 }
  0x2f   : > { %v282_v9 = vsel %vm281_vm1, %v273_v5, 0.0  ;;  %v292_v10 = vsel %vm281_vm1, %v277_v6, 0.0  ;;  %s310_s15 = scalar_lea.sflag [#allocation4], %s851_s0  ;;  %s632_s8 = sshra.s32 %s327_s22, 4  ;;  %s633_s8 = int_to_ptr.hbm [resolvable:$true] %s632_s8 }
  0x30   : > { %v283_v11 = vsel %vm281_vm1, %v274_v7, 0.0  ;;  %v293_v12 = vsel %vm281_vm1, %v278_v8, 0.0  ;;  %s634_s9 = scalar_lea.hbm %s633_s8, 1  ;;  %s638_s29 = scalar_lea.hbm %s947_s2, 2 }
  0x31   : > { %v284_v13 = vadd.f32 %v283_v11, %v282_v9  ;;  %v294_v14 = vadd.f32 %v293_v12, %v292_v10  ;;  %p635_p4 = scmp.ne.s32.totalorder %s633_s8, %s634_s9  ;;  %p639_p7 = scmp.lt.s32.totalorder %s633_s8, %s947_s2 }
  0x32   : > { %p640_p8 = scmp.lt.s32.totalorder %s638_s29, %s634_s9 }
  0x33   : > { %v285_v15 = vrot.slane %v284_v13, 4  ;;  %v295_v16 = vrot.slane %v294_v14, 4  ;;  %v302_v25 = vld [vmem:[%s865_s30] sm:$0x1]  ;;  %p636_p5 = pnand %p635_p4, %p812_p9 }
  0x34   : > { %v306_v26 = vld [vmem:[%s870_s10] sm:$0x1]  ;;  %p641_p10 = por %p640_p8, %p639_p7 }
  0x35   : > { %v286_v17 = vadd.f32 %v285_v15, %v284_v13  ;;  %v296_v18 = vadd.f32 %v295_v16, %v294_v14  ;;  %p637_p6 = pneg %p636_p5 }
  0x37   : > { %v287_v19 = vrot.slane %v286_v17, 2  ;;  %v297_v20 = vrot.slane %v296_v18, 2  ;;  %p642_p13 = pnand %p641_p10, %p637_p6 }
  0x39   : > { %v288_v21 = vadd.f32 %v287_v19, %v286_v17  ;;  %v298_v22 = vadd.f32 %v297_v20, %v296_v18 }
  0x3b   : > { %v289_v23 = vrot.slane %v288_v21, 1  ;;  %v299_v24 = vrot.slane %v298_v22, 1 }
  0x3d   : > { %v290_v27 = vadd.f32 %v289_v23, %v288_v21  ;;  %v300_v28 = vadd.f32 %v299_v24, %v298_v22 }
  0x3f   : > { %v303_v29 = vadd.f32 %v302_v25, %v290_v27  ;;  %v307_v30 = vadd.f32 %v306_v26, %v300_v28 }
  0x41   : > { %305 = vst.msk [vmem:[%s865_s30] sm:$0x1] %vm266_vm0, %v303_v29 }
  0x42   : > { %308 = vst.msk [vmem:[%s870_s10] sm:$0x1] %vm266_vm0, %v307_v30 }
  0x43   : > { %645 = shalt.err (!%p642_p13)
}
  0x44   : > { %487 = dma.vmem_to_hbm [thread:$0]  (%p812_p9), %s325_s5, 16, %s327_s22, %s310_s15  }
  0x45   : > { %s314_s30 = scalar_lea.sflag [#allocation9], %s851_s0  ;;  %s660_s10 = sshra.s32 %s340_s7, 4  ;;  %s661_s10 = int_to_ptr.hbm [resolvable:$true] %s660_s10 }
  0x46   : > { %s662_s19 = scalar_lea.hbm %s661_s10, 1  ;;  %s666_s4 = scalar_lea.hbm %s948_s3, 2 }
  0x47   : > { %p663_p0 = scmp.ne.s32.totalorder %s661_s10, %s662_s19  ;;  %p667_p3 = scmp.lt.s32.totalorder %s661_s10, %s948_s3 }
  0x48   : > { %p668_p4 = scmp.lt.s32.totalorder %s666_s4, %s662_s19 }
  0x49   : > { %p664_p1 = pnand %p663_p0, %p812_p9 }
  0x4a   : > { %p669_p5 = por %p668_p4, %p667_p3 }
  0x4b   : > { %p665_p2 = pneg %p664_p1 }
  0x4d   : > { %p670_p6 = pnand %p669_p5, %p665_p2 }
  0x4f   : > { %673 = shalt.err (!%p670_p6)
}
  0x50   : > { %488 = dma.vmem_to_hbm [thread:$0]  (%p812_p9), %s888_s6, 16, %s340_s7, %s314_s30  }
  0x51 PF: > { %s351_s0 = sand.u32 1, %s716_s12   ;;  %p499_p7 = pnand %p469_p12, %p819_p11 }
  0x52   : > { %s352_s5 = scalar_lea.sflag [#allocation4], %s351_s0 }
  0x53   : > { %p500_p8 = pneg %p499_p7 }
  0x55   : > { %707 = dma.done.wait (%p500_p8), %s352_s5, 16  }
  0x56   : > { %709 = vsyncadd (%p500_p8), %s352_s5, 4294967280  ;;  %s361_s22 = scalar_lea.sflag [#allocation9], %s351_s0 }
  0x57   : > { %711 = dma.done.wait (%p500_p8), %s361_s22, 16  }
  0x58   : > { %713 = vsyncadd (%p500_p8), %s361_s22, 4294967280  ;;  %s26_s17 = sadd.s32 1, %s736_s17   ;;  %s956_s12 = smov %s720_s13 }
  0x59   : > { %p23_p10 = scmp.ge.s32.totalorder %s26_s17, 4   ;;  %s957_s13 = smov %s724_s14 }
  0x5a   : > { %s958_s14 = smov %s817_s26  ;;  %s959_s15 = smov %s732_s16 }
  0x5b   : > { %s960_s16 = smov %s962_s20  ;;  %25 = sbr.rel (!%p23_p10) target bundleno = 12 (0xc), region = 107 }
  0x60   :  { %366 = vsyncpa [#allocation3], 1 }
  0x61   :  { %368 = vsyncpa [#allocation3 + $0x1], 1 }
  0x62   :  { %369 = vsyncpa [#allocation6], 1 }
  0x63   :  { %371 = vsyncpa [#allocation6 + $0x1], 1 }
  0x64   :  { %372 = vsyncpa [#allocation4], 1 }
  0x65   :  { %374 = vsyncpa [#allocation4 + $0x1], 1 }
  0x66   :  { %375 = vsyncpa [#allocation9], 1 }
  0x67   :  { %377 = vsyncpa [#allocation9 + $0x1], 1 }

</bundles_post_ra>
